<compile_context>
chip_gen: v7x
topology: tpu7x:2x2x1
jax: 0.10.0
libtpu: 0.0.40
codegen_flags: <defaults>
</compile_context>

<pallas_src>
import functools

import jax
import jax.numpy as jnp
from jax import lax
from jax.experimental import pallas as pl
from jax.experimental.pallas import tpu as pltpu

EPS = 1e-5
LANE = 128


def _round_up(x, m):
    return (x + m - 1) // m * m


def _vmem_limit_bytes():
    """Generation-aware scoped-VMEM limit (v5e/v6e: 128 MiB, v7x: 64 MiB)."""
    cap = 64 * 1024 * 1024                      # conservative v7x fallback
    try:
        info = pltpu.get_tpu_info()
        cap = int(getattr(info, "vmem_capacity_bytes", cap))
    except Exception:
        pass
    return max(32 * 1024 * 1024, min(int(cap * 3 // 4), 96 * 1024 * 1024))


def _pick_tile_rows(N, H, W8, Kp, Cp, vmem_limit):
    """Largest divisor of H whose real per-step footprint fits the budget."""
    budget = int(vmem_limit * 0.6)
    for th in range(H, 0, -1):
        if H % th:
            continue
        if N == 1 and th == H and H > 1:
            continue                            # keep >=2 blocks for megacore
        q_in = 2 * th * W8 * Kp * 2             # double-buffered main strip (bf16)
        halo = 2 * 2 * W8 * Kp * 2              # two 1-row halo blocks, 2x buffered
        wgt = 2 * 3 * Kp * Cp * 2               # weights, counted double-buffered
        bias = 2 * Cp * 4
        yout = 2 * th * W8 * Cp * 2             # double-buffered bf16 output
        sout = 2 * 8 * Cp * 4
        acc = th * W8 * Cp * 4                  # f32 scratch accumulator
        tmp = th * W8 * Kp * 2 + 2 * th * W8 * Cp * 4   # loaded strip + temporaries
        if q_in + halo + wgt + bias + yout + sout + acc + tmp <= budget:
            return th
    return 1


# ---------------- Pallas kernels ----------------

def _conv3x3_relu_stats_kernel(qa_ref, qh0_ref, qh1_ref, w_ref, b_ref,
                               y_ref, st_ref, acc_ref, *, w_real):
    """3x3 conv (dx pre-folded into lanes) + bias + ReLU + partial BN stats.

    qa:  (1, TH, W8, K)   rows [t*TH, t*TH+TH) of the dx-folded input (bf16)
    qh0: (1, 1,  W8, K)   halo row t*TH+TH     (bf16)
    qh1: (1, 1,  W8, K)   halo row t*TH+TH+1   (bf16)
    w:   (3, K, Co)       per-dy weights, K index = dx*Ci + ci (bf16)
    b:   (1, Co)          bias (f32)
    y:   (1, TH, W8, Co)  relu(conv + bias), bf16
    st:  (1, 1, 8, Co)    row0 = sum(y), row1 = sum(y*y) over this tile (f32)
    acc: (TH*W8, Co)      f32 VMEM scratch accumulator
    """
    _, th, w8, k = qa_ref.shape
    co = w_ref.shape[2]
    nb1 = (th - 1) * w8
    nb2 = (th - 2) * w8

    a = qa_ref[0].reshape(th * w8, k)           # bf16 LHS, row index = r*W8 + j
    h0 = qh0_ref[0, 0]                          # (W8, K)
    h1 = qh1_ref[0, 0]                          # (W8, K)

    # dy = 0: every output row comes from the main strip.
    acc_ref[...] = jnp.dot(a, w_ref[0], preferred_element_type=jnp.float32)

    # dy = 1: strip rows 1..TH-1 -> output rows 0..TH-2; halo row 0 -> row TH-1.
    if th > 1:
        acc_ref[:nb1, :] = acc_ref[:nb1, :] + jnp.dot(
            a[w8:, :], w_ref[1], preferred_element_type=jnp.float32)
    acc_ref[nb1:, :] = acc_ref[nb1:, :] + jnp.dot(
        h0, w_ref[1], preferred_element_type=jnp.float32)

    # dy = 2: strip rows 2..TH-1 -> rows 0..TH-3; halos -> rows TH-2 / TH-1.
    if th > 2:
        acc_ref[:nb2, :] = acc_ref[:nb2, :] + jnp.dot(
            a[2 * w8:, :], w_ref[2], preferred_element_type=jnp.float32)
    if th > 1:
        acc_ref[nb2:nb1, :] = acc_ref[nb2:nb1, :] + jnp.dot(
            h0, w_ref[2], preferred_element_type=jnp.float32)
    acc_ref[nb1:, :] = acc_ref[nb1:, :] + jnp.dot(
        h1, w_ref[2], preferred_element_type=jnp.float32)

    # Bias + ReLU, stored as bf16 (halves inter-stage HBM traffic).
    yb = jnp.maximum(acc_ref[...] + b_ref[...], 0.0).astype(y_ref.dtype)
    y_ref[0] = yb.reshape(th, w8, co)

    # Partial BatchNorm statistics on the bf16-rounded values actually used
    # downstream; junk columns from the W -> W8 pad are masked out.
    yf = yb.astype(jnp.float32)
    if w_real != w8:
        col = lax.broadcasted_iota(jnp.int32, (th * w8, 1), 0) % w8
        yf = jnp.where(col < w_real, yf, 0.0)
    s = jnp.sum(yf, axis=0, keepdims=True)
    ss = jnp.sum(yf * yf, axis=0, keepdims=True)
    ridx = lax.broadcasted_iota(jnp.int32, (8, co), 0)
    st_ref[0, 0] = jnp.where(ridx == 0, s, jnp.where(ridx == 1, ss, 0.0))


def _bn_affine_kernel(y_ref, sc_ref, sh_ref, o_ref, *, w_real, c_real):
    # y: (1, TH, W8, Cp) bf16 ; sc/sh: (1, Cp) f32 ; o: (1, TH, W, c_real) f32.
    y = y_ref[0].astype(jnp.float32)
    out = y * sc_ref[...] + sh_ref[...]
    o_ref[0] = out[:, :w_real, :c_real]


# ---------------- wrappers around pallas_call ----------------

def _dx_fold(x, W8, Kp):
    """x: (N, H, W, C) real-channel activations. Returns the dx-folded,
    zero-padded, lane-padded conv input (N, H+2, W8, Kp) in bf16:
    q[n, h, w, dx*C + c] = pad(x)[n, h, w + dx, c]  (exactly 1 bottom pad row)."""
    N, H, W, C = x.shape
    p = jnp.pad(x, ((0, 0), (1, 1), (1, 1), (0, 0)))
    q = jnp.concatenate(
        [p[:, :, 0:W, :], p[:, :, 1:W + 1, :], p[:, :, 2:W + 2, :]], axis=-1)
    q = jnp.pad(q, ((0, 0), (0, 0), (0, W8 - W), (0, Kp - 3 * C)))
    return q.astype(jnp.bfloat16)


def _prep_conv_params(w_oihw, bias, Kp, Cp):
    co, ci, kh, kw = w_oihw.shape
    # w2[dy, dx*ci + c, o] = w[o, c, dy, dx]  (matches the q lane layout)
    w = jnp.transpose(w_oihw, (2, 3, 1, 0)).reshape(kh, kw * ci, co)
    w = jnp.pad(w, ((0, 0), (0, Kp - kw * ci), (0, Cp - co))).astype(jnp.bfloat16)
    b = jnp.pad(bias, (0, Cp - co)).astype(jnp.float32).reshape(1, Cp)
    return w, b


def _pallas_conv_stage(q, wmat, bias2, H, W, TH, vmem_limit):
    N, HP, W8, Kp = q.shape
    Cp = wmat.shape[2]
    T = H // TH
    # Halo-row bound: the last tile reads padded rows H and H+1.
    assert HP == H + 2, "dx-folded input must have exactly one bottom pad row"
    assert (T - 1) * TH + TH + 1 <= HP - 1

    y, stats = pl.pallas_call(
        functools.partial(_conv3x3_relu_stats_kernel, w_real=W),
        out_shape=(jax.ShapeDtypeStruct((N, H, W8, Cp), jnp.bfloat16),
                   jax.ShapeDtypeStruct((N, T, 8, Cp), jnp.float32)),
        grid=(N, T),
        in_specs=[
            # main strip: padded rows [t*TH, t*TH+TH)
            pl.BlockSpec((1, TH, W8, Kp), lambda n, t: (n, t, 0, 0)),
            # two 1-row halo blocks (padded rows t*TH+TH and t*TH+TH+1)
            pl.BlockSpec((1, 1, W8, Kp), lambda n, t: (n, t * TH + TH, 0, 0)),
            pl.BlockSpec((1, 1, W8, Kp), lambda n, t: (n, t * TH + TH + 1, 0, 0)),
            # weights / bias resident across the whole grid
            pl.BlockSpec((3, Kp, Cp), lambda n, t: (0, 0, 0)),
            pl.BlockSpec((1, Cp), lambda n, t: (0, 0)),
        ],
        out_specs=(
            pl.BlockSpec((1, TH, W8, Cp), lambda n, t: (n, t, 0, 0)),
            pl.BlockSpec((1, 1, 8, Cp), lambda n, t: (n, t, 0, 0)),
        ),
        scratch_shapes=[pltpu.VMEM((TH * W8, Cp), jnp.float32)],
        compiler_params=pltpu.CompilerParams(
            dimension_semantics=("parallel", "parallel"),
            vmem_limit_bytes=vmem_limit),
    )(q, q, q, wmat, bias2)
    return y, stats


def _pallas_bn_affine(y, scale, shift, W, c_real, TH, vmem_limit):
    N, H, W8, Cp = y.shape
    T = H // TH
    return pl.pallas_call(
        functools.partial(_bn_affine_kernel, w_real=W, c_real=c_real),
        out_shape=jax.ShapeDtypeStruct((N, H, W, c_real), jnp.float32),
        grid=(N, T),
        in_specs=[pl.BlockSpec((1, TH, W8, Cp), lambda n, t: (n, t, 0, 0)),
                  pl.BlockSpec((1, Cp), lambda n, t: (0, 0)),
                  pl.BlockSpec((1, Cp), lambda n, t: (0, 0))],
        out_specs=pl.BlockSpec((1, TH, W, c_real), lambda n, t: (n, t, 0, 0)),
        compiler_params=pltpu.CompilerParams(
            dimension_semantics=("parallel", "parallel"),
            vmem_limit_bytes=vmem_limit),
    )(y, scale, shift)


def _bn_scale_shift(stats, gamma, beta, count, Cp):
    tot = jnp.sum(stats, axis=(0, 1))          # (8, Cp): rows 0/1 = sum / sumsq
    mean = tot[0] / count
    var = jnp.maximum(tot[1] / count - mean * mean, 0.0)
    g = jnp.pad(gamma, (0, Cp - gamma.shape[0])).astype(jnp.float32)
    b = jnp.pad(beta, (0, Cp - beta.shape[0])).astype(jnp.float32)
    scale = g * lax.rsqrt(var + EPS)
    shift = b - mean * scale
    return scale, shift


@functools.partial(jax.jit, static_argnames=("tile_rows",))
def unet_block_forward(params, x_nchw, tile_rows=None):
    """UNetBlock forward: conv1 -> ReLU -> BN1 -> conv2 -> ReLU -> BN2 (NCHW I/O)."""
    x = jnp.transpose(x_nchw, (0, 2, 3, 1)).astype(jnp.float32)      # -> NHWC
    N, H, W, ci = x.shape
    co = params['conv1_w'].shape[0]
    W8 = _round_up(W, 8)
    Cp = _round_up(max(co, LANE), LANE)
    K1 = _round_up(max(3 * ci, LANE), LANE)
    K2 = _round_up(max(3 * co, LANE), LANE)
    vmem_limit = _vmem_limit_bytes()
    if tile_rows is None:
        tile_rows = _pick_tile_rows(N, H, W8, max(K1, K2), Cp, vmem_limit)
    assert H % tile_rows == 0, "tile_rows must divide H"
    cnt = jnp.float32(N * H * W)

    # ---- stage 1: conv1 + ReLU (+ BN1 batch statistics) ----
    q1 = _dx_fold(x, W8, K1)
    w1m, b1 = _prep_conv_params(params['conv1_w'], params['conv1_b'], K1, Cp)
    y1, st1 = _pallas_conv_stage(q1, w1m, b1, H, W, tile_rows, vmem_limit)
    sc1, sh1 = _bn_scale_shift(st1, params['norm1_g'], params['norm1_b'], cnt, Cp)

    # ---- stage 2: BN1 affine rides the memory-bound pad / dx-fold pass ----
    a1 = y1[:, :, :W, :co].astype(jnp.float32) * sc1[:co] + sh1[:co]
    q2 = _dx_fold(a1, W8, K2)
    w2m, b2 = _prep_conv_params(params['conv2_w'], params['conv2_b'], K2, Cp)
    y2, st2 = _pallas_conv_stage(q2, w2m, b2, H, W, tile_rows, vmem_limit)
    sc2, sh2 = _bn_scale_shift(st2, params['norm2_g'], params['norm2_b'], cnt, Cp)

    # ---- BN2 affine at real channel count -> cheap NCHW transpose ----
    out = _pallas_bn_affine(y2, sc2.reshape(1, Cp), sh2.reshape(1, Cp),
                            W, co, tile_rows, vmem_limit)
    return jnp.transpose(out, (0, 3, 1, 2))                          # -> NCHW


# ---------------- deterministic parameter init ----------------

def init_params(key, filters_in, filters_out):
    k1, k2 = jax.random.split(key, 2)

    def wconv(k, c_out, c_in):
        return 0.1 * jax.random.normal(k, (c_out, c_in, 3, 3), jnp.float32)

    def aff(n, s):
        return s * jnp.arange(n, dtype=jnp.float32)

    return {
        'conv1_w': wconv(k1, filters_out, filters_in),
        'conv1_b': aff(filters_out, 0.01),
        'norm1_g': 1.0 + aff(filters_out, 0.05),
        'norm1_b': aff(filters_out, 0.02),
        'conv2_w': wconv(k2, filters_out, filters_out),
        'conv2_b': aff(filters_out, 0.01),
        'norm2_g': 1.0 + aff(filters_out, 0.05),
        'norm2_b': aff(filters_out, 0.02),
    }


# ---------------- pure-JAX reference (for self-check) ----------------

def _ref_conv3x3(x, w_oihw, b):
    w_hwio = jnp.transpose(w_oihw, (2, 3, 1, 0))
    y = lax.conv_general_dilated(x, w_hwio, (1, 1), 'SAME',
                                 dimension_numbers=('NHWC', 'HWIO', 'NHWC'))
    return y + b.reshape(1, 1, 1, -1)


def _ref_bn(x, g, bta):
    mean = jnp.mean(x, axis=(0, 1, 2))
    var = jnp.mean((x - mean) ** 2, axis=(0, 1, 2))
    return (x - mean) / jnp.sqrt(var + EPS) * g + bta


def ref_forward(params, x_nchw):
    x = jnp.transpose(x_nchw, (0, 2, 3, 1)).astype(jnp.float32)
    x = _ref_bn(jnp.maximum(_ref_conv3x3(x, params['conv1_w'], params['conv1_b']), 0),
                params['norm1_g'], params['norm1_b'])
    x = _ref_bn(jnp.maximum(_ref_conv3x3(x, params['conv2_w'], params['conv2_b']), 0),
                params['norm2_g'], params['norm2_b'])
    return jnp.transpose(x, (0, 3, 1, 2))


if __name__ == "__main__":
    filters_in, filters_out = 8, 4
    N, H, W = 2, 16, 16

    key = jax.random.PRNGKey(0)
    kx, kp = jax.random.split(key)
    x = jax.random.normal(kx, (N, filters_in, H, W), jnp.float32)
    params = init_params(kp, filters_in, filters_out)

    # tile_rows=8 -> 2 row tiles per image, exercising the halo / tiling path.
    out = jax.block_until_ready(unet_block_forward(params, x, tile_rows=8))
    ref = jax.block_until_ready(ref_forward(params, x))

    assert out.shape == (N, filters_out, H, W), out.shape
    err = float(jnp.max(jnp.abs(out - ref)) /
                jnp.maximum(1.0, jnp.max(jnp.abs(ref))))
    assert err < 3e-2, f"max relative error {err}"
    print("KERNEL_OK")
</pallas_src>

<mosaic_0001>
module attributes {stable_mosaic.version = 11 : i64} {
  func.func @_conv3x3_relu_stats_kernel(%arg0: i32, %arg1: i32, %arg2: memref<1x8x16x128xbf16, #tpu.memory_space<vmem>>, %arg3: memref<1x1x16x128xbf16, #tpu.memory_space<vmem>>, %arg4: memref<1x1x16x128xbf16, #tpu.memory_space<vmem>>, %arg5: memref<3x128x128xbf16, #tpu.memory_space<vmem>>, %arg6: memref<1x128xf32, #tpu.memory_space<vmem>>, %arg7: memref<1x8x16x128xbf16, #tpu.memory_space<vmem>>, %arg8: memref<1x1x8x128xf32, #tpu.memory_space<vmem>>, %arg9: memref<128x128xf32, #tpu.memory_space<vmem>>) attributes {dimension_semantics = [#tpu.dimension_semantics<parallel>, #tpu.dimension_semantics<parallel>], iteration_bounds = array<i64: 2, 2>, scalar_prefetch = 0 : i64, scratch_operands = 1 : i64, tpu.core_type = #tpu.core_type<tc>, window_params = [{transform_indices = @transform_0, window_bounds = array<i64: 1, 8, 16, 128>}, {transform_indices = @transform_1, window_bounds = array<i64: 1, 1, 16, 128>}, {transform_indices = @transform_2, window_bounds = array<i64: 1, 1, 16, 128>}, {pipeline_mode = #tpu.pipeline_mode<synchronous>, transform_indices = @transform_3, window_bounds = array<i64: 3, 128, 128>}, {pipeline_mode = #tpu.pipeline_mode<synchronous>, transform_indices = @transform_4, window_bounds = array<i64: 1, 128>}, {transform_indices = @transform_5, window_bounds = array<i64: 1, 8, 16, 128>}, {transform_indices = @transform_6, window_bounds = array<i64: 1, 1, 8, 128>}]} {
    %c0 = arith.constant 0 : index
    %c0_0 = arith.constant 0 : index
    %c0_1 = arith.constant 0 : index
    %c0_2 = arith.constant 0 : index
    %0 = vector.load %arg2[%c0, %c0_0, %c0_1, %c0_2] : memref<1x8x16x128xbf16, #tpu.memory_space<vmem>>, vector<1x8x16x128xbf16>
    %1 = vector.shape_cast %0 : vector<1x8x16x128xbf16> to vector<8x16x128xbf16>
    %2 = vector.shape_cast %1 : vector<8x16x128xbf16> to vector<128x128xbf16>
    %c0_3 = arith.constant 0 : index
    %c0_4 = arith.constant 0 : index
    %c0_5 = arith.constant 0 : index
    %c0_6 = arith.constant 0 : index
    %3 = vector.load %arg3[%c0_3, %c0_4, %c0_5, %c0_6] : memref<1x1x16x128xbf16, #tpu.memory_space<vmem>>, vector<1x1x16x128xbf16>
    %4 = vector.shape_cast %3 : vector<1x1x16x128xbf16> to vector<16x128xbf16>
    %c0_7 = arith.constant 0 : index
    %c0_8 = arith.constant 0 : index
    %c0_9 = arith.constant 0 : index
    %c0_10 = arith.constant 0 : index
    %5 = vector.load %arg4[%c0_7, %c0_8, %c0_9, %c0_10] : memref<1x1x16x128xbf16, #tpu.memory_space<vmem>>, vector<1x1x16x128xbf16>
    %6 = vector.shape_cast %5 : vector<1x1x16x128xbf16> to vector<16x128xbf16>
    %c0_11 = arith.constant 0 : index
    %c0_12 = arith.constant 0 : index
    %c0_13 = arith.constant 0 : index
    %7 = vector.load %arg5[%c0_11, %c0_12, %c0_13] : memref<3x128x128xbf16, #tpu.memory_space<vmem>>, vector<1x128x128xbf16>
    %8 = vector.shape_cast %7 : vector<1x128x128xbf16> to vector<128x128xbf16>
    %cst = arith.constant dense<0.000000e+00> : vector<128x128xf32>
    %9 = tpu.matmul %2, %8, %cst {dimension_numbers = #tpu.dot_dimension_numbers<[1], [0], [0], [1], [0, 0, 1, 1], [], []>} : vector<128x128xbf16>, vector<128x128xbf16>, vector<128x128xf32> -> vector<128x128xf32>
    %c0_14 = arith.constant 0 : index
    %c0_15 = arith.constant 0 : index
    %10 = vector.load %arg9[%c0_14, %c0_15] : memref<128x128xf32, #tpu.memory_space<vmem>>, vector<128x128xf32>
    tpu.vector_store %arg9[%c0_14, %c0_15], %9 {strides = array<i32>} : memref<128x128xf32, #tpu.memory_space<vmem>>, vector<128x128xf32>,
    %c0_16 = arith.constant 0 : index
    %c0_17 = arith.constant 0 : index
    %11 = vector.load %arg9[%c0_16, %c0_17] : memref<128x128xf32, #tpu.memory_space<vmem>>, vector<112x128xf32>
    %12 = vector.extract_strided_slice %2 {offsets = [16, 0], sizes = [112, 128], strides = [1, 1]} : vector<128x128xbf16> to vector<112x128xbf16>
    %c1 = arith.constant 1 : index
    %c0_18 = arith.constant 0 : index
    %c0_19 = arith.constant 0 : index
    %13 = vector.load %arg5[%c1, %c0_18, %c0_19] : memref<3x128x128xbf16, #tpu.memory_space<vmem>>, vector<1x128x128xbf16>
    %14 = vector.shape_cast %13 : vector<1x128x128xbf16> to vector<128x128xbf16>
    %cst_20 = arith.constant dense<0.000000e+00> : vector<112x128xf32>
    %15 = tpu.matmul %12, %14, %cst_20 {dimension_numbers = #tpu.dot_dimension_numbers<[1], [0], [0], [1], [0, 0, 1, 1], [], []>} : vector<112x128xbf16>, vector<128x128xbf16>, vector<112x128xf32> -> vector<112x128xf32>
    %16 = arith.addf %11, %15 : vector<112x128xf32>
    %c0_21 = arith.constant 0 : index
    %c0_22 = arith.constant 0 : index
    %17 = vector.load %arg9[%c0_21, %c0_22] : memref<128x128xf32, #tpu.memory_space<vmem>>, vector<112x128xf32>
    tpu.vector_store %arg9[%c0_21, %c0_22], %16 {strides = array<i32>} : memref<128x128xf32, #tpu.memory_space<vmem>>, vector<112x128xf32>,
    %c112 = arith.constant 112 : index
    %c0_23 = arith.constant 0 : index
    %18 = vector.load %arg9[%c112, %c0_23] : memref<128x128xf32, #tpu.memory_space<vmem>>, vector<16x128xf32>
    %c1_24 = arith.constant 1 : index
    %c0_25 = arith.constant 0 : index
    %c0_26 = arith.constant 0 : index
    %19 = vector.load %arg5[%c1_24, %c0_25, %c0_26] : memref<3x128x128xbf16, #tpu.memory_space<vmem>>, vector<1x128x128xbf16>
    %20 = vector.shape_cast %19 : vector<1x128x128xbf16> to vector<128x128xbf16>
    %cst_27 = arith.constant dense<0.000000e+00> : vector<16x128xf32>
    %21 = tpu.matmul %4, %20, %cst_27 {dimension_numbers = #tpu.dot_dimension_numbers<[1], [0], [0], [1], [0, 0, 1, 1], [], []>} : vector<16x128xbf16>, vector<128x128xbf16>, vector<16x128xf32> -> vector<16x128xf32>
    %22 = arith.addf %18, %21 : vector<16x128xf32>
    %c112_28 = arith.constant 112 : index
    %c0_29 = arith.constant 0 : index
    %23 = vector.load %arg9[%c112_28, %c0_29] : memref<128x128xf32, #tpu.memory_space<vmem>>, vector<16x128xf32>
    tpu.vector_store %arg9[%c112_28, %c0_29], %22 {strides = array<i32>} : memref<128x128xf32, #tpu.memory_space<vmem>>, vector<16x128xf32>,
    %c0_30 = arith.constant 0 : index
    %c0_31 = arith.constant 0 : index
    %24 = vector.load %arg9[%c0_30, %c0_31] : memref<128x128xf32, #tpu.memory_space<vmem>>, vector<96x128xf32>
    %25 = vector.extract_strided_slice %2 {offsets = [32, 0], sizes = [96, 128], strides = [1, 1]} : vector<128x128xbf16> to vector<96x128xbf16>
    %c2 = arith.constant 2 : index
    %c0_32 = arith.constant 0 : index
    %c0_33 = arith.constant 0 : index
    %26 = vector.load %arg5[%c2, %c0_32, %c0_33] : memref<3x128x128xbf16, #tpu.memory_space<vmem>>, vector<1x128x128xbf16>
    %27 = vector.shape_cast %26 : vector<1x128x128xbf16> to vector<128x128xbf16>
    %cst_34 = arith.constant dense<0.000000e+00> : vector<96x128xf32>
    %28 = tpu.matmul %25, %27, %cst_34 {dimension_numbers = #tpu.dot_dimension_numbers<[1], [0], [0], [1], [0, 0, 1, 1], [], []>} : vector<96x128xbf16>, vector<128x128xbf16>, vector<96x128xf32> -> vector<96x128xf32>
    %29 = arith.addf %24, %28 : vector<96x128xf32>
    %c0_35 = arith.constant 0 : index
    %c0_36 = arith.constant 0 : index
    %30 = vector.load %arg9[%c0_35, %c0_36] : memref<128x128xf32, #tpu.memory_space<vmem>>, vector<96x128xf32>
    tpu.vector_store %arg9[%c0_35, %c0_36], %29 {strides = array<i32>} : memref<128x128xf32, #tpu.memory_space<vmem>>, vector<96x128xf32>,
    %c96 = arith.constant 96 : index
    %c0_37 = arith.constant 0 : index
    %31 = vector.load %arg9[%c96, %c0_37] : memref<128x128xf32, #tpu.memory_space<vmem>>, vector<16x128xf32>
    %c2_38 = arith.constant 2 : index
    %c0_39 = arith.constant 0 : index
    %c0_40 = arith.constant 0 : index
    %32 = vector.load %arg5[%c2_38, %c0_39, %c0_40] : memref<3x128x128xbf16, #tpu.memory_space<vmem>>, vector<1x128x128xbf16>
    %33 = vector.shape_cast %32 : vector<1x128x128xbf16> to vector<128x128xbf16>
    %cst_41 = arith.constant dense<0.000000e+00> : vector<16x128xf32>
    %34 = tpu.matmul %4, %33, %cst_41 {dimension_numbers = #tpu.dot_dimension_numbers<[1], [0], [0], [1], [0, 0, 1, 1], [], []>} : vector<16x128xbf16>, vector<128x128xbf16>, vector<16x128xf32> -> vector<16x128xf32>
    %35 = arith.addf %31, %34 : vector<16x128xf32>
    %c96_42 = arith.constant 96 : index
    %c0_43 = arith.constant 0 : index
    %36 = vector.load %arg9[%c96_42, %c0_43] : memref<128x128xf32, #tpu.memory_space<vmem>>, vector<16x128xf32>
    tpu.vector_store %arg9[%c96_42, %c0_43], %35 {strides = array<i32>} : memref<128x128xf32, #tpu.memory_space<vmem>>, vector<16x128xf32>,
    %c112_44 = arith.constant 112 : index
    %c0_45 = arith.constant 0 : index
    %37 = vector.load %arg9[%c112_44, %c0_45] : memref<128x128xf32, #tpu.memory_space<vmem>>, vector<16x128xf32>
    %c2_46 = arith.constant 2 : index
    %c0_47 = arith.constant 0 : index
    %c0_48 = arith.constant 0 : index
    %38 = vector.load %arg5[%c2_46, %c0_47, %c0_48] : memref<3x128x128xbf16, #tpu.memory_space<vmem>>, vector<1x128x128xbf16>
    %39 = vector.shape_cast %38 : vector<1x128x128xbf16> to vector<128x128xbf16>
    %cst_49 = arith.constant dense<0.000000e+00> : vector<16x128xf32>
    %40 = tpu.matmul %6, %39, %cst_49 {dimension_numbers = #tpu.dot_dimension_numbers<[1], [0], [0], [1], [0, 0, 1, 1], [], []>} : vector<16x128xbf16>, vector<128x128xbf16>, vector<16x128xf32> -> vector<16x128xf32>
    %41 = arith.addf %37, %40 : vector<16x128xf32>
    %c112_50 = arith.constant 112 : index
    %c0_51 = arith.constant 0 : index
    %42 = vector.load %arg9[%c112_50, %c0_51] : memref<128x128xf32, #tpu.memory_space<vmem>>, vector<16x128xf32>
    tpu.vector_store %arg9[%c112_50, %c0_51], %41 {strides = array<i32>} : memref<128x128xf32, #tpu.memory_space<vmem>>, vector<16x128xf32>,
    %c0_52 = arith.constant 0 : index
    %c0_53 = arith.constant 0 : index
    %43 = vector.load %arg9[%c0_52, %c0_53] : memref<128x128xf32, #tpu.memory_space<vmem>>, vector<128x128xf32>
    %c0_54 = arith.constant 0 : index
    %c0_55 = arith.constant 0 : index
    %44 = vector.load %arg6[%c0_54, %c0_55] : memref<1x128xf32, #tpu.memory_space<vmem>>, vector<1x128xf32>
    %45 = vector.broadcast %44 : vector<1x128xf32> to vector<128x128xf32>
    %46 = arith.addf %43, %45 : vector<128x128xf32>
    %cst_56 = arith.constant 0.000000e+00 : f32
    %47 = vector.broadcast %cst_56 : f32 to vector<128x128xf32>
    %48 = arith.maximumf %46, %47 : vector<128x128xf32>
    %49 = arith.truncf %48 : vector<128x128xf32> to vector<128x128xbf16>
    %50 = vector.shape_cast %49 : vector<128x128xbf16> to vector<8x16x128xbf16>
    %c0_57 = arith.constant 0 : index
    %c0_58 = arith.constant 0 : index
    %c0_59 = arith.constant 0 : index
    %c0_60 = arith.constant 0 : index
    %51 = vector.load %arg7[%c0_57, %c0_58, %c0_59, %c0_60] : memref<1x8x16x128xbf16, #tpu.memory_space<vmem>>, vector<1x8x16x128xbf16>
    %52 = vector.shape_cast %51 : vector<1x8x16x128xbf16> to vector<8x16x128xbf16>
    %53 = vector.shape_cast %50 : vector<8x16x128xbf16> to vector<1x8x16x128xbf16>
    tpu.vector_store %arg7[%c0_57, %c0_58, %c0_59, %c0_60], %53 {strides = array<i32>} : memref<1x8x16x128xbf16, #tpu.memory_space<vmem>>, vector<1x8x16x128xbf16>,
    %54 = arith.extf %49 : vector<128x128xbf16> to vector<128x128xf32>
    %cst_61 = arith.constant dense<0.000000e+00> : vector<128xf32>
    %55 = vector.multi_reduction <add>, %54, %cst_61 [0] : vector<128x128xf32> to vector<128xf32>
    %56 = vector.shape_cast %55 : vector<128xf32> to vector<1x128xf32>
    %57 = arith.mulf %54, %54 : vector<128x128xf32>
    %cst_62 = arith.constant dense<0.000000e+00> : vector<128xf32>
    %58 = vector.multi_reduction <add>, %57, %cst_62 [0] : vector<128x128xf32> to vector<128xf32>
    %59 = vector.shape_cast %58 : vector<128xf32> to vector<1x128xf32>
    %60 = tpu.iota {dimensions = array<i32: 0>} : vector<8x128xi32>
    %c0_i32 = arith.constant 0 : i32
    %61 = vector.broadcast %c0_i32 : i32 to vector<8x128xi32>
    %62 = arith.cmpi eq, %60, %61 : vector<8x128xi32>
    %c1_i32 = arith.constant 1 : i32
    %63 = vector.broadcast %c1_i32 : i32 to vector<8x128xi32>
    %64 = arith.cmpi eq, %60, %63 : vector<8x128xi32>
    %cst_63 = arith.constant 0.000000e+00 : f32
    %65 = vector.shape_cast %59 : vector<1x128xf32> to vector<1x128xf32>
    %66 = vector.broadcast %65 : vector<1x128xf32> to vector<8x128xf32>
    %67 = vector.broadcast %cst_63 : f32 to vector<8x128xf32>
    %68 = arith.select %64, %66, %67 : vector<8x128xi1>, vector<8x128xf32>
    %69 = vector.shape_cast %56 : vector<1x128xf32> to vector<1x128xf32>
    %70 = vector.broadcast %69 : vector<1x128xf32> to vector<8x128xf32>
    %71 = arith.select %62, %70, %68 : vector<8x128xi1>, vector<8x128xf32>
    %c0_64 = arith.constant 0 : index
    %c0_65 = arith.constant 0 : index
    %c0_66 = arith.constant 0 : index
    %c0_67 = arith.constant 0 : index
    %72 = vector.load %arg8[%c0_64, %c0_65, %c0_66, %c0_67] : memref<1x1x8x128xf32, #tpu.memory_space<vmem>>, vector<1x1x8x128xf32>
    %73 = vector.shape_cast %72 : vector<1x1x8x128xf32> to vector<8x128xf32>
    %74 = vector.shape_cast %71 : vector<8x128xf32> to vector<1x1x8x128xf32>
    tpu.vector_store %arg8[%c0_64, %c0_65, %c0_66, %c0_67], %74 {strides = array<i32>} : memref<1x1x8x128xf32, #tpu.memory_space<vmem>>, vector<1x1x8x128xf32>,
    return
  }
  func.func @transform_0(%arg0: i32, %arg1: i32) -> (i32, i32, i32, i32) {
    %c0_i32 = arith.constant 0 : i32
    %c0_i32_0 = arith.constant 0 : i32
    %c0_i32_1 = arith.constant 0 : i32
    return %arg0, %arg1, %c0_i32, %c0_i32_0 : i32, i32, i32, i32
  }
  func.func @transform_1(%arg0: i32, %arg1: i32) -> (i32, i32, i32, i32) {
    %c8_i32 = arith.constant 8 : i32
    %0 = arith.muli %arg1, %c8_i32 : i32
    %c8_i32_0 = arith.constant 8 : i32
    %1 = arith.addi %0, %c8_i32_0 : i32
    %c0_i32 = arith.constant 0 : i32
    %c0_i32_1 = arith.constant 0 : i32
    %c0_i32_2 = arith.constant 0 : i32
    return %arg0, %1, %c0_i32, %c0_i32_1 : i32, i32, i32, i32
  }
  func.func @transform_2(%arg0: i32, %arg1: i32) -> (i32, i32, i32, i32) {
    %c8_i32 = arith.constant 8 : i32
    %0 = arith.muli %arg1, %c8_i32 : i32
    %c8_i32_0 = arith.constant 8 : i32
    %1 = arith.addi %0, %c8_i32_0 : i32
    %c1_i32 = arith.constant 1 : i32
    %2 = arith.addi %1, %c1_i32 : i32
    %c0_i32 = arith.constant 0 : i32
    %c0_i32_1 = arith.constant 0 : i32
    %c0_i32_2 = arith.constant 0 : i32
    return %arg0, %2, %c0_i32, %c0_i32_1 : i32, i32, i32, i32
  }
  func.func @transform_3(%arg0: i32, %arg1: i32) -> (i32, i32, i32) {
    %c0_i32 = arith.constant 0 : i32
    %c0_i32_0 = arith.constant 0 : i32
    %c0_i32_1 = arith.constant 0 : i32
    %c0_i32_2 = arith.constant 0 : i32
    return %c0_i32, %c0_i32_0, %c0_i32_1 : i32, i32, i32
  }
  func.func @transform_4(%arg0: i32, %arg1: i32) -> (i32, i32) {
    %c0_i32 = arith.constant 0 : i32
    %c0_i32_0 = arith.constant 0 : i32
    %c0_i32_1 = arith.constant 0 : i32
    return %c0_i32, %c0_i32_0 : i32, i32
  }
  func.func @transform_5(%arg0: i32, %arg1: i32) -> (i32, i32, i32, i32) {
    %c0_i32 = arith.constant 0 : i32
    %c0_i32_0 = arith.constant 0 : i32
    %c0_i32_1 = arith.constant 0 : i32
    return %arg0, %arg1, %c0_i32, %c0_i32_0 : i32, i32, i32, i32
  }
  func.func @transform_6(%arg0: i32, %arg1: i32) -> (i32, i32, i32, i32) {
    %c0_i32 = arith.constant 0 : i32
    %c0_i32_0 = arith.constant 0 : i32
    %c0_i32_1 = arith.constant 0 : i32
    return %arg0, %arg1, %c0_i32, %c0_i32_0 : i32, i32, i32, i32
  }
}

module attributes {stable_mosaic.version = 11 : i64} {
  func.func @_bn_affine_kernel(%arg0: i32, %arg1: i32, %arg2: memref<1x8x16x128xbf16, #tpu.memory_space<vmem>>, %arg3: memref<1x128xf32, #tpu.memory_space<vmem>>, %arg4: memref<1x128xf32, #tpu.memory_space<vmem>>, %arg5: memref<1x8x16x4xf32, #tpu.memory_space<vmem>>) attributes {dimension_semantics = [#tpu.dimension_semantics<parallel>, #tpu.dimension_semantics<parallel>], iteration_bounds = array<i64: 2, 2>, scalar_prefetch = 0 : i64, scratch_operands = 0 : i64, tpu.core_type = #tpu.core_type<tc>, window_params = [{transform_indices = @transform_0, window_bounds = array<i64: 1, 8, 16, 128>}, {pipeline_mode = #tpu.pipeline_mode<synchronous>, transform_indices = @transform_1, window_bounds = array<i64: 1, 128>}, {pipeline_mode = #tpu.pipeline_mode<synchronous>, transform_indices = @transform_2, window_bounds = array<i64: 1, 128>}, {transform_indices = @transform_3, window_bounds = array<i64: 1, 8, 16, 4>}]} {
    %c0 = arith.constant 0 : index
    %c0_0 = arith.constant 0 : index
    %c0_1 = arith.constant 0 : index
    %c0_2 = arith.constant 0 : index
    %0 = vector.load %arg2[%c0, %c0_0, %c0_1, %c0_2] : memref<1x8x16x128xbf16, #tpu.memory_space<vmem>>, vector<1x8x16x128xbf16>
    %1 = vector.shape_cast %0 : vector<1x8x16x128xbf16> to vector<8x16x128xbf16>
    %2 = arith.extf %1 : vector<8x16x128xbf16> to vector<8x16x128xf32>
    %c0_3 = arith.constant 0 : index
    %c0_4 = arith.constant 0 : index
    %3 = vector.load %arg3[%c0_3, %c0_4] : memref<1x128xf32, #tpu.memory_space<vmem>>, vector<1x128xf32>
    %4 = vector.shape_cast %3 : vector<1x128xf32> to vector<1x1x128xf32>
    %5 = vector.broadcast %4 : vector<1x1x128xf32> to vector<8x16x128xf32>
    %6 = arith.mulf %2, %5 : vector<8x16x128xf32>
    %c0_5 = arith.constant 0 : index
    %c0_6 = arith.constant 0 : index
    %7 = vector.load %arg4[%c0_5, %c0_6] : memref<1x128xf32, #tpu.memory_space<vmem>>, vector<1x128xf32>
    %8 = vector.shape_cast %7 : vector<1x128xf32> to vector<1x1x128xf32>
    %9 = vector.broadcast %8 : vector<1x1x128xf32> to vector<8x16x128xf32>
    %10 = arith.addf %6, %9 : vector<8x16x128xf32>
    %11 = vector.extract_strided_slice %10 {offsets = [0, 0, 0], sizes = [8, 16, 4], strides = [1, 1, 1]} : vector<8x16x128xf32> to vector<8x16x4xf32>
    %c0_7 = arith.constant 0 : index
    %c0_8 = arith.constant 0 : index
    %c0_9 = arith.constant 0 : index
    %c0_10 = arith.constant 0 : index
    %12 = vector.load %arg5[%c0_7, %c0_8, %c0_9, %c0_10] : memref<1x8x16x4xf32, #tpu.memory_space<vmem>>, vector<1x8x16x4xf32>
    %13 = vector.shape_cast %12 : vector<1x8x16x4xf32> to vector<8x16x4xf32>
    %14 = vector.shape_cast %11 : vector<8x16x4xf32> to vector<1x8x16x4xf32>
    tpu.vector_store %arg5[%c0_7, %c0_8, %c0_9, %c0_10], %14 {strides = array<i32>} : memref<1x8x16x4xf32, #tpu.memory_space<vmem>>, vector<1x8x16x4xf32>,
    return
  }
  func.func @transform_0(%arg0: i32, %arg1: i32) -> (i32, i32, i32, i32) {
    %c0_i32 = arith.constant 0 : i32
    %c0_i32_0 = arith.constant 0 : i32
    %c0_i32_1 = arith.constant 0 : i32
    return %arg0, %arg1, %c0_i32, %c0_i32_0 : i32, i32, i32, i32
  }
  func.func @transform_1(%arg0: i32, %arg1: i32) -> (i32, i32) {
    %c0_i32 = arith.constant 0 : i32
    %c0_i32_0 = arith.constant 0 : i32
    %c0_i32_1 = arith.constant 0 : i32
    return %c0_i32, %c0_i32_0 : i32, i32
  }
  func.func @transform_2(%arg0: i32, %arg1: i32) -> (i32, i32) {
    %c0_i32 = arith.constant 0 : i32
    %c0_i32_0 = arith.constant 0 : i32
    %c0_i32_1 = arith.constant 0 : i32
    return %c0_i32, %c0_i32_0 : i32, i32
  }
  func.func @transform_3(%arg0: i32, %arg1: i32) -> (i32, i32, i32, i32) {
    %c0_i32 = arith.constant 0 : i32
    %c0_i32_0 = arith.constant 0 : i32
    %c0_i32_1 = arith.constant 0 : i32
    return %arg0, %arg1, %c0_i32, %c0_i32_0 : i32, i32, i32, i32
  }
}

</mosaic_0001>

<bundles_post_ra>
// kernel: unet_block_forward.5
= control target key start
LH: loop header
LB: loop body
LE: loop exit
PB: predicated region body
PF: predicated region fallthrough
CT: control target
= control target key end

     0   :  { %s565_s12 = smov 0   ;;  %s567_s13 = smov 0   ;;  %s666_s0 = inlined_call_operand.vmem [shape: bf16[2,16,16,128], index: 0, kind: input, shape index: {}]   ;;  %s667_s1 = inlined_call_operand.vmem [shape: f32[1,128], index: 1, kind: input, shape index: {}]   ;;  %s668_s2 = inlined_call_operand.vmem [shape: f32[1,128], index: 2, kind: input, shape index: {}]   ;;  %s669_s3 = inlined_call_operand.vmem [shape: f32[2,16,16,4], index: 3, kind: output, shape index: {}]  }
   0x1   :  { %s569_s14 = smov 0   ;;  %s571_s15 = smov 0  }
   0x2   :  { %s573_s16 = smov 0  }
   0x3 LB: > { %s22_s17 = sadd.s32 1, %s535_s14  ;;  %s25_s18 = sadd.s32 1, %s539_s15  ;;  %s543_s16 = sphi %s573_s16, %s13_s16   ;;  %s539_s15 = sphi %s571_s15, %s673_s15   ;;  %s535_s14 = sphi %s569_s14, %s672_s14   ;;  %s531_s13 = sphi %s567_s13, %s671_s13   ;;  %s527_s12 = sphi %s565_s12, %s670_s12  }
   0x4   : > { %p23_p0 = scmp.ge.s32.totalorder %s22_s17, 2  ;;  %p413_p1 = scmp.ge.s32.totalorder %s543_s16, 1 }
   0x5   : > { %p159_p2 = scmp.lt.s32.totalorder %s543_s16, 5 }
   0x6   : > { %s675_s17 = smov (%p23_p0, %s22_s17), 0  ;;  %s677_s18 = smov (!%p23_p0, %s25_s18), %s539_s15 }
   0x7   : > { %p160_p3 = pnand %p413_p1, %p159_p2  ;;  %p27_p4 = scmp.ge.s32.totalorder %s677_s18, 2 }
   0x8   : > { %s414_s19 = sshll.u32 (!%p160_p3), %s527_s12, 3  ;;  %p194_p5 = scmp.lt.s32.totalorder (!%p160_p3), %s531_s13, 1  ;;  %v422_v0 = vld [vmem:[%s667_s1] ss:$0 sm:$0xff] (!%p160_p3)  ;;  %vm293_vm0 = vcmask (!%p160_p3), 31744  }
   0x9   : > { %s679_s18 = smov (%p27_p4, %s677_s18), 0  ;;  %163 = sbr.rel (%p160_p3) target bundleno = 38 (0x26), region = 32 }
   0xa   : > { %p196_p6 = scmp.lt.s32.totalorder (!%p160_p3), %s414_s19, 15  ;;  %v423_v9 = vld [vmem:[%s668_s2] ss:$0 sm:$0xff] (!%p160_p3) }
  0x10   : > { %s681_s13 = smov (!%p194_p5, %s531_s13), 1  ;;  %s683_s19 = smov (!%p196_p6, %s414_s19), 15 }
  0x11   : > { %s416_s20 = sshll.u32 %s681_s13, 5  ;;  %s415_s21 = sshll.u32 %s683_s19, 1 }
  0x12   : > { %s200_s22 = sadd.s32 %s416_s20, %s415_s21 }
  0x13   : > { %s417_s23 = sshll.u32 %s200_s22, 2  ;;  %s421_s29 = sshll.u32 %s200_s22, 3 }
  0x14   : > { %s598_s26 = scalar_lea.vmem %s666_s0, %s417_s23  ;;  %s613_s7 = scalar_lea.vmem %s669_s3, %s421_s29 }
  0x15   : > { %v427_v1 = vld [vmem:[%s598_s26] sm:$0xff]   ;;  %v458_v2 = vld [vmem:[%s598_s26 + $0x8] sm:$0xff]   ;;  %v459_v3 = vld [vmem:[%s598_s26 + $0x10] sm:$0xff]  }
  0x16   : > { %v428_v4 = vunpack.c.l.bf16 %v427_v1  ;;  %v429_v5 = vunpack.c.h.bf16 %v427_v1  ;;  %v432_v6 = vunpack.c.l.bf16 %v458_v2  ;;  %v433_v7 = vunpack.c.h.bf16 %v458_v2  ;;  %v460_v8 = vld [vmem:[%s598_s26 + $0x18] sm:$0xff]   ;;  %v461_v22 = vld [vmem:[%s598_s26 + $0x20] sm:$0xff]   ;;  %v462_v23 = vld [vmem:[%s598_s26 + $0x28] sm:$0xff]  }
  0x17   : > { %v436_v10 = vunpack.c.l.bf16 %v459_v3  ;;  %v437_v11 = vunpack.c.h.bf16 %v459_v3  ;;  %v440_v12 = vunpack.c.l.bf16 %v460_v8  ;;  %v441_v13 = vunpack.c.h.bf16 %v460_v8  ;;  %v463_v28 = vld [vmem:[%s598_s26 + $0x30] sm:$0xff]   ;;  %v464_v29 = vld [vmem:[%s598_s26 + $0x38] sm:$0xff]  }
  0x18   : > { %v254_v14 = vmul.f32 %v428_v4, %v422_v0  ;;  %v255_v15 = vmul.f32 %v429_v5, %v422_v0  ;;  %v256_v16 = vmul.f32 %v432_v6, %v422_v0  ;;  %v257_v17 = vmul.f32 %v433_v7, %v422_v0 }
  0x19   : > { %v258_v18 = vmul.f32 %v436_v10, %v422_v0  ;;  %v259_v19 = vmul.f32 %v437_v11, %v422_v0  ;;  %v260_v20 = vmul.f32 %v440_v12, %v422_v0  ;;  %v261_v21 = vmul.f32 %v441_v13, %v422_v0 }
  0x1a   : > { %v277_v24 = vadd.f32 %v423_v9, %v254_v14  ;;  %v278_v25 = vadd.f32 %v423_v9, %v255_v15  ;;  %v279_v26 = vadd.f32 %v423_v9, %v256_v16  ;;  %v280_v27 = vadd.f32 %v423_v9, %v257_v17 }
  0x1b   : > { %v281_v30 = vadd.f32 %v423_v9, %v258_v18  ;;  %v282_v31 = vadd.f32 %v423_v9, %v259_v19  ;;  %v283_v32 = vadd.f32 %v423_v9, %v260_v20  ;;  %v284_v33 = vadd.f32 %v423_v9, %v261_v21 }
  0x1c   : > { %294 = vst.msk [vmem:[%s613_s7] sm:$0xff] %vm293_vm0, %v277_v24  ;;  %295 = vst.msk [vmem:[%s613_s7 + $0x8] sm:$0xff] %vm293_vm0, %v278_v25  ;;  %v444_v34 = vunpack.c.l.bf16 %v461_v22  ;;  %v445_v35 = vunpack.c.h.bf16 %v461_v22  ;;  %v448_v36 = vunpack.c.l.bf16 %v462_v23  ;;  %v449_v37 = vunpack.c.h.bf16 %v462_v23 }
  0x1d   : > { %296 = vst.msk [vmem:[%s613_s7 + $0x10] sm:$0xff] %vm293_vm0, %v279_v26  ;;  %297 = vst.msk [vmem:[%s613_s7 + $0x18] sm:$0xff] %vm293_vm0, %v280_v27  ;;  %v452_v38 = vunpack.c.l.bf16 %v463_v28  ;;  %v453_v39 = vunpack.c.h.bf16 %v463_v28  ;;  %v456_v40 = vunpack.c.l.bf16 %v464_v29  ;;  %v457_v41 = vunpack.c.h.bf16 %v464_v29 }
  0x1e   : > { %298 = vst.msk [vmem:[%s613_s7 + $0x20] sm:$0xff] %vm293_vm0, %v281_v30  ;;  %299 = vst.msk [vmem:[%s613_s7 + $0x28] sm:$0xff] %vm293_vm0, %v282_v31  ;;  %v262_v42 = vmul.f32 %v444_v34, %v422_v0  ;;  %v263_v43 = vmul.f32 %v445_v35, %v422_v0  ;;  %v264_v44 = vmul.f32 %v448_v36, %v422_v0 }
  0x1f   : > { %300 = vst.msk [vmem:[%s613_s7 + $0x30] sm:$0xff] %vm293_vm0, %v283_v32  ;;  %301 = vst.msk [vmem:[%s613_s7 + $0x38] sm:$0xff] %vm293_vm0, %v284_v33  ;;  %v265_v45 = vmul.f32 %v449_v37, %v422_v0  ;;  %v266_v46 = vmul.f32 %v452_v38, %v422_v0  ;;  %v267_v47 = vmul.f32 %v453_v39, %v422_v0 }
  0x20   : > { %v268_v48 = vmul.f32 %v456_v40, %v422_v0  ;;  %v269_v49 = vmul.f32 %v457_v41, %v422_v0  ;;  %v285_v50 = vadd.f32 %v423_v9, %v262_v42  ;;  %v286_v51 = vadd.f32 %v423_v9, %v263_v43 }
  0x21   : > { %v287_v52 = vadd.f32 %v423_v9, %v264_v44  ;;  %v288_v53 = vadd.f32 %v423_v9, %v265_v45  ;;  %v289_v54 = vadd.f32 %v423_v9, %v266_v46  ;;  %v290_v55 = vadd.f32 %v423_v9, %v267_v47 }
  0x22   : > { %v291_v56 = vadd.f32 %v423_v9, %v268_v48  ;;  %v292_v57 = vadd.f32 %v423_v9, %v269_v49  ;;  %302 = vst.msk [vmem:[%s613_s7 + $0x40] sm:$0xff] %vm293_vm0, %v285_v50  ;;  %303 = vst.msk [vmem:[%s613_s7 + $0x48] sm:$0xff] %vm293_vm0, %v286_v51 }
  0x23   : > { %304 = vst.msk [vmem:[%s613_s7 + $0x50] sm:$0xff] %vm293_vm0, %v287_v52  ;;  %305 = vst.msk [vmem:[%s613_s7 + $0x58] sm:$0xff] %vm293_vm0, %v288_v53 }
  0x24   : > { %306 = vst.msk [vmem:[%s613_s7 + $0x60] sm:$0xff] %vm293_vm0, %v289_v54  ;;  %307 = vst.msk [vmem:[%s613_s7 + $0x68] sm:$0xff] %vm293_vm0, %v290_v55 }
  0x25   : > { %308 = vst.msk [vmem:[%s613_s7 + $0x70] sm:$0xff] %vm293_vm0, %v291_v56  ;;  %309 = vst.msk [vmem:[%s613_s7 + $0x78] sm:$0xff] %vm293_vm0, %v292_v57 }
  0x26 PF: > { %s13_s16 = sadd.s32 1, %s543_s16   ;;  %s670_s12 = smov %s535_s14 }
  0x27   : > { %p10_p7 = scmp.ge.s32.totalorder %s13_s16, 6   ;;  %s671_s13 = smov %s539_s15 }
  0x28   : > { %s672_s14 = smov %s675_s17  ;;  %s673_s15 = smov %s679_s18 }
  0x29   :  { %12 = sbr.rel (!%p10_p7) target bundleno = 3 (0x3), region = 62 }

// kernel: unet_block_forward.3
= control target key start
LH: loop header
LB: loop body
LE: loop exit
PB: predicated region body
PF: predicated region fallthrough
CT: control target
= control target key end

     0   :  { %s2469_s21 = smov 0   ;;  %s2471_s22 = smov 0   ;;  %s2862_s0 = inlined_call_operand.vmem [shape: bf16[2,18,16,128], index: 0, kind: input, shape index: {}, may-alias: {0,1,2}]   ;;  %s2863_s1 = inlined_call_operand.vmem [shape: bf16[2,18,16,128], index: 1, kind: input, shape index: {}, may-alias: {0,1,2}]   ;;  %s2864_s2 = inlined_call_operand.vmem [shape: bf16[2,18,16,128], index: 2, kind: input, shape index: {}, may-alias: {0,1,2}]   ;;  %s2865_s3 = inlined_call_operand.vmem [shape: bf16[3,128,128], index: 3, kind: input, shape index: {}]   ;;  %s2866_s4 = inlined_call_operand.vmem [shape: f32[1,128], index: 4, kind: input, shape index: {}]   ;;  %s2867_s5 = inlined_call_operand.vmem [shape: bf16[2,16,16,128], index: 5, kind: output, shape index: {0}]   ;;  %s2868_s6 = inlined_call_operand.vmem [shape: f32[2,2,8,128], index: 6, kind: output, shape index: {1}]  }
   0x1   :  { %s2473_s23 = smov 0   ;;  %s2475_s24 = smov 0  }
   0x2   :  { %s2477_s25 = smov 0  }
   0x3 LB: > { %s26_s26 = sadd.s32 1, %s2422_s23  ;;  %s29_s27 = sadd.s32 1, %s2426_s24  ;;  %s2430_s25 = sphi %s2477_s25, %s17_s25   ;;  %s2426_s24 = sphi %s2475_s24, %s2872_s24   ;;  %s2422_s23 = sphi %s2473_s23, %s2871_s23   ;;  %s2418_s22 = sphi %s2471_s22, %s2870_s22   ;;  %s2414_s21 = sphi %s2469_s21, %s2869_s21  }
   0x4   : > { %p27_p0 = scmp.ge.s32.totalorder %s26_s26, 2  ;;  %p1819_p1 = scmp.ge.s32.totalorder %s2430_s25, 1 }
   0x5   : > { %p297_p2 = scmp.lt.s32.totalorder %s2430_s25, 5 }
   0x6   : > { %s2874_s26 = smov (%p27_p0, %s26_s26), 0  ;;  %s2876_s27 = smov (!%p27_p0, %s29_s27), %s2426_s24 }
   0x7   : > { %p298_p3 = pnand %p1819_p1, %p297_p2  ;;  %p31_p4 = scmp.ge.s32.totalorder %s2876_s27, 2 }
   0x8   : > { %v2334_v0 = vld [vmem:[%s2865_s3] sm:$0xff] (!%p298_p3)   ;;  %v2432_v1 = vmov (!%p298_p3), 0.0   ;;  %v2336_v3 = vld [vmem:[%s2865_s3 + $0x8] sm:$0xff] (!%p298_p3)   ;;  %vm2433_vm0 = vmmov (!%p298_p3), 0   ;;  %s2516_s10 = sshll.u32 (!%p298_p3), %s2414_s21, 3  ;;  %p378_p5 = scmp.lt.s32.totalorder (!%p298_p3), %s2418_s22, 1 }
   0x9   : > { %s2878_s27 = smov (%p31_p4, %s2876_s27), 0  ;;  %301 = sbr.rel (%p298_p3) target bundleno = 375 (0x177), region = 40 }
   0xa   : > { %2159 = vmatprep.subr.bf16.mxu1 (!%p298_p3), %v2432_v1  ;;  %v2335_v2 = vld [vmem:[%s2865_s3 + $0x40] sm:$0xff] (!%p298_p3)   ;;  %2127 = vmatprep.subr.bf16.mxu0 (!%p298_p3), %v2334_v0  ;;  %v2337_v4 = vld [vmem:[%s2865_s3 + $0x48] sm:$0xff] (!%p298_p3)   ;;  %v2338_v5 = vld [vmem:[%s2865_s3 + $0x10] sm:$0xff] (!%p298_p3)   ;;  %p380_p6 = scmp.lt.s32.totalorder (!%p298_p3), %s2516_s10, 17  ;;  %s394_s20 = sadd.s32 (!%p298_p3), 8, %s2516_s10 }
   0xb   : > { %2175 = vmatprep.mubr.msk.bf16.mxu1 (!%p298_p3), %vm2433_vm0, %v2432_v1  ;;  %2160 = vmatpush3.bf16.msra.mxu1 (!%p298_p3), %v2335_v2  ;;  %v2339_v6 = vld [vmem:[%s2865_s3 + $0x50] sm:$0xff] (!%p298_p3)   ;;  %v2340_v7 = vld [vmem:[%s2865_s3 + $0x18] sm:$0xff] (!%p298_p3)   ;;  %v2342_v9 = vld [vmem:[%s2865_s3 + $0x20] sm:$0xff] (!%p298_p3)   ;;  %p397_p7 = scmp.lt.s32.totalorder (!%p298_p3), %s394_s20, 17  ;;  %s407_s19 = sadd.s32 (!%p298_p3), 9, %s2516_s10 }
   0xc   : > { %2128 = vmatpush3.bf16.msra.mxu0 (!%p298_p3), %v2334_v0  ;;  %2161 = vmatprep.subr.bf16.mxu1 (!%p298_p3), %v2432_v1  ;;  %v2341_v8 = vld [vmem:[%s2865_s3 + $0x58] sm:$0xff] (!%p298_p3)   ;;  %v2343_v10 = vld [vmem:[%s2865_s3 + $0x60] sm:$0xff] (!%p298_p3)   ;;  %v2344_v11 = vld [vmem:[%s2865_s3 + $0x28] sm:$0xff] (!%p298_p3)   ;;  %p410_p8 = scmp.lt.s32.totalorder (!%p298_p3), %s407_s19, 17  ;;  %p422_p9 = scmp.lt.s32.totalorder (!%p298_p3), %s2516_s10, 15 }
   0xd   : > { %2129 = vmatprep.subr.bf16.mxu0 (!%p298_p3), %v2336_v3  ;;  %v2345_v13 = vld [vmem:[%s2865_s3 + $0x68] sm:$0xff] (!%p298_p3)   ;;  %v2346_v14 = vld [vmem:[%s2865_s3 + $0x30] sm:$0xff] (!%p298_p3)   ;;  %v2348_v16 = vld [vmem:[%s2865_s3 + $0x38] sm:$0xff] (!%p298_p3)   ;;  %p432_p10 = scmp.lt.s32.totalorder (!%p298_p3), %s2414_s21, 1 }
   0xe   : > { %v2347_v15 = vld [vmem:[%s2865_s3 + $0x70] sm:$0xff] (!%p298_p3)   ;;  %v2349_v17 = vld [vmem:[%s2865_s3 + $0x78] sm:$0xff] (!%p298_p3)   ;;  %v2352_v18 = vld [vmem:[%s2865_s3 + $0x80] sm:$0xff] (!%p298_p3)  }
   0xf   : > { %2162 = vmatpush3.bf16.msra.mxu1 (!%p298_p3), %v2337_v4  ;;  %v2353_v20 = vld [vmem:[%s2865_s3 + $0x40] sm:$0xff] (!%p298_p3)   ;;  %v2355_v21 = vld [vmem:[%s2865_s3 + $0x88] sm:$0xff] (!%p298_p3)   ;;  %v2360_v24 = vld [vmem:[%s2865_s3 + $0x90] sm:$0xff] (!%p298_p3)  }
  0x10   : > { %s2880_s22 = smov (!%p378_p5, %s2418_s22), 1  ;;  %2130 = vmatpush3.bf16.msra.mxu0 %v2336_v3  ;;  %2163 = vmatprep.subr.bf16.mxu1 %v2432_v1  ;;  %s2882_s20 = smov (!%p397_p7, %s394_s20), 17  ;;  %v2354_v23 = vld [vmem:[%s2865_s3 + $0x48] sm:$0xff]   ;;  %v2358_v26 = vld [vmem:[%s2865_s3 + $0x50] sm:$0xff]   ;;  %v2364_v28 = vld [vmem:[%s2865_s3 + $0x98] sm:$0xff]  }
  0x11   : > { %s381_s15 = scalar_select %p380_p6, %s2516_s10, 17  ;;  %2131 = vmatprep.subr.bf16.mxu0 %v2338_v5  ;;  %v2359_v29 = vld [vmem:[%s2865_s3 + $0x58] sm:$0xff]   ;;  %v2369_v30 = vld [vmem:[%s2865_s3 + $0xa0] sm:$0xff]   ;;  %v2373_v34 = vld [vmem:[%s2865_s3 + $0xa8] sm:$0xff]  }
  0x12   : > { %s2535_s18 = smul.u32 36, %s2880_s22  ;;  %s1824_s16 = sshll.u32 %s2882_s20, 1  ;;  %v2363_v32 = vld [vmem:[%s2865_s3 + $0x60] sm:$0xff]   ;;  %v2365_v35 = vld [vmem:[%s2865_s3 + $0x68] sm:$0xff]   ;;  %v2368_v37 = vld [vmem:[%s2865_s3 + $0x70] sm:$0xff]  }
  0x13   : > { %s1821_s28 = sshll.u32 %s381_s15, 1  ;;  %2164 = vmatpush3.bf16.msra.mxu1 %v2339_v6  ;;  %s2884_s19 = smov (!%p410_p8, %s407_s19), 17  ;;  %v2375_v38 = vld [vmem:[%s2865_s3 + $0xb0] sm:$0xff]   ;;  %v2370_v39 = vld [vmem:[%s2865_s3 + $0x78] sm:$0xff]   ;;  %v2372_v42 = vld [vmem:[%s2865_s3 + $0x80] sm:$0xff]  }
  0x14   : > { %s384_s29 = sadd.s32 %s2535_s18, %s1821_s28  ;;  %2132 = vmatpush3.bf16.msra.mxu0 %v2338_v5  ;;  %2165 = vmatprep.subr.bf16.mxu1 %v2432_v1  ;;  %s401_s28 = sadd.s32 %s2535_s18, %s1824_s16  ;;  %v2378_v40 = vld [vmem:[%s2865_s3 + $0xb8] sm:$0xff]   ;;  %v2374_v43 = vld [vmem:[%s2865_s3 + $0x88] sm:$0xff]   ;;  %v2376_v44 = vld [vmem:[%s2865_s3 + $0x90] sm:$0xff]  }
  0x15   : > { %s1822_s30 = sshll.u32 %s384_s29, 2  ;;  %2133 = vmatprep.subr.bf16.mxu0 %v2340_v7  ;;  %s1825_s8 = sshll.u32 %s401_s28, 2  ;;  %v2377_v45 = vld [vmem:[%s2865_s3 + $0x98] sm:$0xff]   ;;  %v2379_v46 = vld [vmem:[%s2865_s3 + $0xa0] sm:$0xff]   ;;  %v2380_v47 = vld [vmem:[%s2865_s3 + $0xa8] sm:$0xff]  }
  0x16   : > { %s2552_s14 = scalar_lea.vmem %s2862_s0, %s1822_s30  ;;  %s2608_s17 = scalar_lea.vmem %s2863_s1, %s1825_s8  ;;  %v2381_v48 = vld [vmem:[%s2865_s3 + $0x80] sm:$0xff]   ;;  %v2382_v49 = vld [vmem:[%s2865_s3 + $0xb0] sm:$0xff]   ;;  %v2383_v50 = vld [vmem:[%s2865_s3 + $0x88] sm:$0xff]  }
  0x17   : > { %2166 = vmatpush3.bf16.msra.mxu1 %v2341_v8  ;;  %v2350_v12 = vld [vmem:[%s2552_s14] sm:$0xff]   ;;  %v2351_v19 = vld [vmem:[%s2552_s14 + $0x8] sm:$0xff]   ;;  %v2594_v22 = vld [vmem:[%s2552_s14 + $0x10] sm:$0xff]   ;;  %s1827_s15 = sshll.u32 %s2884_s19, 1  ;;  %s2886_s10 = smov (!%p422_p9, %s2516_s10), 15 }
  0x18   : > { %2134 = vmatpush3.bf16.msra.mxu0 %v2340_v7  ;;  %2167 = vmatprep.subr.bf16.mxu1 %v2432_v1  ;;  %v2613_v25 = vld [vmem:[%s2552_s14 + $0x18] sm:$0xff]   ;;  %v2620_v27 = vld [vmem:[%s2552_s14 + $0x20] sm:$0xff]   ;;  %v2638_v31 = vld [vmem:[%s2552_s14 + $0x28] sm:$0xff]   ;;  %s414_s29 = sadd.s32 %s2535_s18, %s1827_s15  ;;  %s1831_s20 = sshll.u32 %s2880_s22, 5 }
  0x19   : > { %2135 = vmatprep.subr.bf16.mxu0 %v2342_v9  ;;  %2143 = vmatprep.mubr.bf16.mxu0 %v2350_v12  ;;  %v2645_v33 = vld [vmem:[%s2552_s14 + $0x30] sm:$0xff]   ;;  %s1828_s19 = sshll.u32 %s414_s29, 2  ;;  %v2661_v36 = vld [vmem:[%s2552_s14 + $0x38] sm:$0xff]   ;;  %v2371_v41 = vld [vmem:[%s2608_s17] sm:$0xff]   ;;  %s2888_s21 = smov (!%p432_p10, %s2414_s21), 1 }
  0x1a   : > { %s2670_s11 = scalar_lea.vmem %s2864_s2, %s1828_s19  ;;  %v2384_v51 = vld [vmem:[%s2865_s3 + $0xb8] sm:$0xff]   ;;  %v2385_v52 = vld [vmem:[%s2865_s3 + $0x90] sm:$0xff]   ;;  %v2387_v54 = vld [vmem:[%s2865_s3 + $0xa0] sm:$0xff]   ;;  %s1833_s12 = sshll.u32 %s2880_s22, 1 }
  0x1b   : > { %2168 = vmatpush3.bf16.msra.mxu1 %v2343_v10  ;;  %v2386_v53 = vld [vmem:[%s2865_s3 + $0x98] sm:$0xff]   ;;  %v2388_v55 = vld [vmem:[%s2865_s3 + $0xa8] sm:$0xff]   ;;  %v2389_v56 = vld [vmem:[%s2865_s3 + $0xb0] sm:$0xff]   ;;  %s435_s13 = sadd.s32 %s1833_s12, %s2888_s21 }
  0x1c   : > { %2136 = vmatpush3.bf16.msra.mxu0 %v2342_v9  ;;  %2169 = vmatprep.subr.bf16.mxu1 %v2432_v1  ;;  %v2390_v57 = vld [vmem:[%s2865_s3 + $0xb8] sm:$0xff]   ;;  %v2391_v58 = vld [vmem:[%s2670_s11] sm:$0xff]   ;;  %s1830_s11 = sshll.u32 %s2886_s10, 1  ;;  %s1834_s14 = sshll.u32 %s435_s13, 3 }
  0x1d   : > { %2137 = vmatprep.subr.bf16.mxu0 %v2344_v11  ;;  %s426_s18 = sadd.s32 %s1831_s20, %s1830_s11  ;;  %s437_s28 = scalar_lea.vmem %s2868_s6, %s1834_s14 }
  0x1e   : > { %s1832_s10 = sshll.u32 %s426_s18, 2 }
  0x1f   : > { %2170 = vmatpush3.bf16.msra.mxu1 %v2345_v13  ;;  %s2810_s9 = scalar_lea.vmem %s2867_s5, %s1832_s10 }
  0x20   : > { %2138 = vmatpush3.bf16.msra.mxu0 %v2344_v11  ;;  %2171 = vmatprep.subr.bf16.mxu1 %v2432_v1 }
  0x21   : > { %2139 = vmatprep.subr.bf16.mxu0 %v2346_v14 }
  0x23   : > { %2172 = vmatpush3.bf16.msra.mxu1 %v2347_v15 }
  0x24   : > { %2140 = vmatpush3.bf16.msra.mxu0 %v2346_v14  ;;  %2173 = vmatprep.subr.bf16.mxu1 %v2432_v1 }
  0x25   : > { %2141 = vmatprep.subr.bf16.mxu0 %v2348_v16 }
  0x27   : > { %2174 = vmatpush3.bf16.msra.mxu1 %v2349_v17 }
  0x28   : > { %2142 = vmatpush3.bf16.msra.mxu0 %v2348_v16  ;;  %2223 = vmatprep.subr.bf16.mxu1 %v2352_v18 }
  0x29   : > { %2203 = vmatprep.subr.bf16.mxu0 %v2432_v1 }
  0x2a   : > { %2176 = vmatmul.mubr.bf16.vlgmr.msra.gmra.mrb[0].mxu1 %v2351_v19 }
  0x2b   : > { %2144 = vmatmul.mubr.bf16.vlgmr.msra.gmra.mrb[0].mxu0 %v2351_v19  ;;  %2224 = vmatpush3.bf16.msra.mxu1 %v2352_v18 }
  0x2c   : > { %2204 = vmatpush3.bf16.msra.mxu0 %v2353_v20  ;;  %2179 = vmatprep.mubr.msk.bf16.mxu1 %vm2433_vm0, %v2432_v1 }
  0x2d   : > { %2205 = vmatprep.subr.bf16.mxu0 %v2432_v1  ;;  %2225 = vmatprep.subr.bf16.mxu1 %v2355_v21 }
  0x2e   : > { %2147 = vmatprep.mubr.bf16.mxu0 %v2594_v22 }
  0x2f   : > { %2226 = vmatpush3.bf16.msra.mxu1 %v2355_v21 }
  0x30   : > { %2206 = vmatpush3.bf16.msra.mxu0 %v2354_v23  ;;  %2227 = vmatprep.subr.bf16.mxu1 %v2360_v24 }
  0x31   : > { %2207 = vmatprep.subr.bf16.mxu0 %v2432_v1 }
  0x32   : > { %2180 = vmatmul.mubr.bf16.gmra.mrb[4].mxu1 %v2594_v22 }
  0x33   : > { %2148 = vmatmul.mubr.bf16.gmra.mrb[4].mxu0 %v2613_v25  ;;  %2183 = vmatprep.mubr.msk.bf16.mxu1 %vm2433_vm0, %v2432_v1 }
  0x34   : > { %2208 = vmatpush3.bf16.msra.mxu0 %v2358_v26  ;;  %2228 = vmatpush3.bf16.msra.mxu1 %v2360_v24 }
  0x35   : > { %2209 = vmatprep.subr.bf16.mxu0 %v2432_v1  ;;  %2151 = vmatprep.mubr.bf16.mxu0 %v2620_v27 }
  0x36   : > { %2229 = vmatprep.subr.bf16.mxu1 %v2364_v28 }
  0x38   : > { %2210 = vmatpush3.bf16.msra.mxu0 %v2359_v29  ;;  %2230 = vmatpush3.bf16.msra.mxu1 %v2364_v28 }
  0x39   : > { %2211 = vmatprep.subr.bf16.mxu0 %v2432_v1  ;;  %2231 = vmatprep.subr.bf16.mxu1 %v2369_v30 }
  0x3a   : > { %2184 = vmatmul.mubr.bf16.gmra.mrb[8].mxu1 %v2613_v25 }
  0x3b   : > { %2152 = vmatmul.mubr.bf16.gmra.mrb[8].mxu0 %v2638_v31  ;;  %2187 = vmatprep.mubr.msk.bf16.mxu1 %vm2433_vm0, %v2432_v1 }
  0x3c   : > { %2212 = vmatpush3.bf16.msra.mxu0 %v2363_v32  ;;  %2155 = vmatprep.mubr.bf16.mxu0 %v2645_v33 }
  0x3d   : > { %2213 = vmatprep.subr.bf16.mxu0 %v2432_v1  ;;  %2232 = vmatpush3.bf16.msra.mxu1 %v2369_v30 }
  0x3e   : > { %2233 = vmatprep.subr.bf16.mxu1 %v2373_v34 }
  0x40   : > { %2214 = vmatpush3.bf16.msra.mxu0 %v2365_v35 }
  0x41   : > { %2215 = vmatprep.subr.bf16.mxu0 %v2432_v1  ;;  %2234 = vmatpush3.bf16.msra.mxu1 %v2373_v34 }
  0x42   : > { %2188 = vmatmul.mubr.bf16.gmra.mrb[12].mxu1 %v2620_v27  ;;  %2235 = vmatprep.subr.bf16.mxu1 %v2375_v38 }
  0x43   : > { %2156 = vmatmul.mubr.bf16.gmra.mrb[12].mxu0 %v2661_v36  ;;  %2191 = vmatprep.mubr.msk.bf16.mxu1 %vm2433_vm0, %v2432_v1 }
  0x44   : > { %2216 = vmatpush3.bf16.msra.mxu0 %v2368_v37  ;;  %2219 = vmatprep.mubr.msk.bf16.mxu0 %vm2433_vm0, %v2432_v1 }
  0x45   : > { %2217 = vmatprep.subr.bf16.mxu0 %v2432_v1  ;;  %2236 = vmatpush3.bf16.msra.mxu1 %v2375_v38 }
  0x46   : > { %2237 = vmatprep.subr.bf16.mxu1 %v2378_v40 }
  0x48   : > { %2218 = vmatpush3.bf16.msra.mxu0 %v2370_v39 }
  0x49   : > { %2251 = vmatprep.subr.bf16.mxu0 %v2432_v1  ;;  %2238 = vmatpush3.bf16.msra.mxu1 %v2378_v40 }
  0x4a   : > { %2192 = vmatmul.mubr.bf16.gmra.mrb[16].mxu1 %v2638_v31  ;;  %2271 = vmatprep.subr.bf16.mxu1 %v2432_v1 }
  0x4b   : > { %2220 = vmatmul.mubr.bf16.vlgmr.msra.gmra.mrb[16].mxu0 %v2371_v41  ;;  %2195 = vmatprep.mubr.msk.bf16.mxu1 %vm2433_vm0, %v2432_v1 }
  0x4c   : > { %2252 = vmatpush3.bf16.msra.mxu0 %v2372_v42  ;;  %2267 = vmatprep.mubr.msk.bf16.mxu0 %vm2433_vm0, %v2432_v1 }
  0x4d   : > { %2253 = vmatprep.subr.bf16.mxu0 %v2432_v1 }
  0x50   : > { %2254 = vmatpush3.bf16.msra.mxu0 %v2374_v43 }
  0x51   : > { %2255 = vmatprep.subr.bf16.mxu0 %v2432_v1 }
  0x52   : > { %2196 = vmatmul.mubr.bf16.gmra.mrb[20].mxu1 %v2645_v33 }
  0x53   : > { %2199 = vmatprep.mubr.msk.bf16.mxu1 %vm2433_vm0, %v2432_v1 }
  0x54   : > { %2256 = vmatpush3.bf16.msra.mxu0 %v2376_v44 }
  0x55   : > { %2257 = vmatprep.subr.bf16.mxu0 %v2432_v1 }
  0x58   : > { %2258 = vmatpush3.bf16.msra.mxu0 %v2377_v45 }
  0x59   : > { %2259 = vmatprep.subr.bf16.mxu0 %v2432_v1 }
  0x5a   : > { %2200 = vmatmul.mubr.bf16.gmra.mrb[24].mxu1 %v2661_v36 }
  0x5b   : > { %2239 = vmatprep.mubr.bf16.mxu1 %v2594_v22 }
  0x5c   : > { %2260 = vmatpush3.bf16.msra.mxu0 %v2379_v46 }
  0x5d   : > { %2261 = vmatprep.subr.bf16.mxu0 %v2432_v1 }
  0x60   : > { %2262 = vmatpush3.bf16.msra.mxu0 %v2380_v47 }
  0x61   : > { %2263 = vmatprep.subr.bf16.mxu0 %v2432_v1 }
  0x62   : > { %2240 = vmatmul.mubr.bf16.vlgmr.msra.gmra.mrb[28].mxu1 %v2613_v25 }
  0x63   : > { %2272 = vmatpush3.bf16.msra.mxu1 %v2381_v48  ;;  %2243 = vmatprep.mubr.bf16.mxu1 %v2620_v27 }
  0x64   : > { %2264 = vmatpush3.bf16.msra.mxu0 %v2382_v49  ;;  %2273 = vmatprep.subr.bf16.mxu1 %v2432_v1 }
  0x65   : > { %2265 = vmatprep.subr.bf16.mxu0 %v2432_v1 }
  0x67   : > { %2274 = vmatpush3.bf16.msra.mxu1 %v2383_v50 }
  0x68   : > { %2266 = vmatpush3.bf16.msra.mxu0 %v2384_v51  ;;  %2275 = vmatprep.subr.bf16.mxu1 %v2432_v1 }
  0x6a   : > { %2244 = vmatmul.mubr.bf16.gmra.mrb[32].mxu1 %v2638_v31 }
  0x6b   : > { %2268 = vmatmul.mubr.bf16.vlgmr.msra.gmra.mrb[20].mxu0 %v2371_v41  ;;  %2276 = vmatpush3.bf16.msra.mxu1 %v2385_v52 }
  0x6c   : > { %2247 = vmatprep.mubr.bf16.mxu1 %v2645_v33  ;;  %2277 = vmatprep.subr.bf16.mxu1 %v2432_v1 }
  0x6f   : > { %2278 = vmatpush3.bf16.msra.mxu1 %v2386_v53 }
  0x70   : > { %2279 = vmatprep.subr.bf16.mxu1 %v2432_v1 }
  0x72   : > { %2248 = vmatmul.mubr.bf16.gmra.mrb[36].mxu1 %v2661_v36 }
  0x73   : > { %2280 = vmatpush3.bf16.msra.mxu1 %v2387_v54  ;;  %2287 = vmatprep.mubr.msk.bf16.mxu1 %vm2433_vm0, %v2432_v1 }
  0x74   : > { %2281 = vmatprep.subr.bf16.mxu1 %v2432_v1 }
  0x77   : > { %2282 = vmatpush3.bf16.msra.mxu1 %v2388_v55 }
  0x78   : > { %2283 = vmatprep.subr.bf16.mxu1 %v2432_v1 }
  0x7b   : > { %2284 = vmatpush3.bf16.msra.mxu1 %v2389_v56 }
  0x7c   : > { %2285 = vmatprep.subr.bf16.mxu1 %v2432_v1 }
  0x7f   : > { %2286 = vmatpush3.bf16.msra.mxu1 %v2390_v57 }
  0x82   : > { %2288 = vmatmul.mubr.bf16.vlgmr.msra.gmra.mrb[40].mxu1 %v2391_v58 }
  0xfd   : > { %v797_v59 = vpop.f32.mrb[0].mxu1 }
  0xfe   : > { %v2145_v60 = vpop.f32.mrb[0].mxu0  ;;  %v2177_v61 = vpop.f32.mrb[1].mxu1 }
  0xff   : > { %v605_v62 = vpop.f32.mrb[1].mxu0  ;;  %v800_v0 = vpop.f32.mrb[2].mxu1 }
 0x100   : > { %v2771_v63 = vadd.f32 %v797_v59, %v605_v62  ;;  %v2146_v2 = vpop.f32.mrb[2].mxu0  ;;  %v2178_v3 = vpop.f32.mrb[3].mxu1 }
 0x101   : > { %v608_v4 = vpop.f32.mrb[3].mxu0 }
 0x102   : > { %v2773_v5 = vadd.f32 %v800_v0, %v608_v4 }
 0x105   : > { %v805_v6 = vpop.f32.mrb[4].mxu1 }
 0x106   : > { %v2149_v7 = vpop.f32.mrb[4].mxu0  ;;  %v854_v8 = vadd.f32 %v2145_v60, %v805_v6  ;;  %v2181_v9 = vpop.f32.mrb[5].mxu1  ;;  %v2799_v60 = vld [vmem:[%s2866_s4] ss:$0 sm:$0xff] }
 0x107   : > { %v621_v1 = vpop.f32.mrb[5].mxu0  ;;  %v808_v10 = vpop.f32.mrb[6].mxu1 }
 0x108   : > { %v2150_v11 = vpop.f32.mrb[6].mxu0  ;;  %v855_v12 = vadd.f32 %v2146_v2, %v808_v10  ;;  %v2182_v13 = vpop.f32.mrb[7].mxu1 }
 0x109   : > { %v624_v14 = vpop.f32.mrb[7].mxu0 }
 0x10d   : > { %v813_v15 = vpop.f32.mrb[8].mxu1 }
 0x10e   : > { %v2153_v16 = vpop.f32.mrb[8].mxu0  ;;  %v2775_v17 = vadd.f32 %v813_v15, %v621_v1  ;;  %v2185_v18 = vpop.f32.mrb[9].mxu1 }
 0x10f   : > { %v637_v19 = vpop.f32.mrb[9].mxu0  ;;  %v816_v20 = vpop.f32.mrb[10].mxu1 }
 0x110   : > { %v2154_v21 = vpop.f32.mrb[10].mxu0  ;;  %v2777_v22 = vadd.f32 %v816_v20, %v624_v14  ;;  %v2186_v23 = vpop.f32.mrb[11].mxu1 }
 0x111   : > { %v640_v24 = vpop.f32.mrb[11].mxu0 }
 0x115   : > { %v821_v25 = vpop.f32.mrb[12].mxu1 }
 0x116   : > { %v2157_v26 = vpop.f32.mrb[12].mxu0  ;;  %v858_v27 = vadd.f32 %v2149_v7, %v821_v25  ;;  %v2189_v28 = vpop.f32.mrb[13].mxu1 }
 0x117   : > { %v653_v29 = vpop.f32.mrb[13].mxu0  ;;  %v824_v30 = vpop.f32.mrb[14].mxu1 }
 0x118   : > { %v2158_v31 = vpop.f32.mrb[14].mxu0  ;;  %v2779_v32 = vadd.f32 %v2150_v11, %v824_v30  ;;  %v2190_v33 = vpop.f32.mrb[15].mxu1 }
 0x119   : > { %v656_v34 = vpop.f32.mrb[15].mxu0 }
 0x11d   : > { %v829_v35 = vpop.f32.mrb[16].mxu1 }
 0x11e   : > { %v986_v36 = vpop.f32.mrb[16].mxu0  ;;  %v2781_v37 = vadd.f32 %v829_v35, %v637_v19  ;;  %v2193_v38 = vpop.f32.mrb[17].mxu1 }
 0x11f   : > { %v2783_v39 = vadd.f32 %v2157_v26, %v986_v36  ;;  %v2221_v40 = vpop.f32.mrb[17].mxu0  ;;  %v832_v41 = vpop.f32.mrb[18].mxu1 }
 0x120   : > { %v989_v42 = vpop.f32.mrb[18].mxu0  ;;  %v2785_v43 = vadd.f32 %v832_v41, %v640_v24  ;;  %v2194_v44 = vpop.f32.mrb[19].mxu1 }
 0x121   : > { %v2787_v45 = vadd.f32 %v2158_v31, %v989_v42  ;;  %v2222_v46 = vpop.f32.mrb[19].mxu0 }
 0x125   : > { %v837_v47 = vpop.f32.mrb[20].mxu1 }
 0x126   : > { %v2789_v48 = vadd.f32 %v2153_v16, %v837_v47  ;;  %v2197_v49 = vpop.f32.mrb[21].mxu1 }
 0x127   : > { %v840_v50 = vpop.f32.mrb[22].mxu1 }
 0x128   : > { %v2791_v51 = vadd.f32 %v2154_v21, %v840_v50  ;;  %v2198_v52 = vpop.f32.mrb[23].mxu1 }
 0x12d   : > { %v845_v53 = vpop.f32.mrb[24].mxu1 }
 0x12e   : > { %v864_v54 = vadd.f32 %v845_v53, %v653_v29  ;;  %v2201_v55 = vpop.f32.mrb[25].mxu1 }
 0x12f   : > { %v848_v56 = vpop.f32.mrb[26].mxu1 }
 0x130   : > { %v865_v57 = vadd.f32 %v848_v56, %v656_v34  ;;  %v2202_v58 = vpop.f32.mrb[27].mxu1 }
 0x135   : > { %v2241_v59 = vpop.f32.mrb[28].mxu1 }
 0x136   : > { %v1157_v61 = vadd.f32 %v2241_v59, %v854_v8  ;;  %v1108_v62 = vpop.f32.mrb[29].mxu1 }
 0x137   : > { %v1155_v0 = vadd.f32 %v1108_v62, %v2771_v63  ;;  %v2242_v2 = vpop.f32.mrb[30].mxu1 }
 0x138   : > { %v1432_v3 = vadd.f32 %v2799_v60, %v1157_v61  ;;  %v1158_v4 = vadd.f32 %v2242_v2, %v855_v12  ;;  %v1111_v6 = vpop.f32.mrb[31].mxu1 }
 0x139   : > { %v1430_v7 = vadd.f32 %v2799_v60, %v1155_v0  ;;  %v1156_v9 = vadd.f32 %v1111_v6, %v2773_v5 }
 0x13a   : > { %v1433_v1 = vadd.f32 %v2799_v60, %v1158_v4  ;;  %v1448_v11 = vmax.f32 %v1432_v3, 0.0 }
 0x13b   : > { %v1431_v10 = vadd.f32 %v2799_v60, %v1156_v9  ;;  %v1446_v13 = vmax.f32 %v1430_v7, 0.0 }
 0x13c   : > { %v1449_v8 = vmax.f32 %v1433_v1, 0.0 }
 0x13d   : > { %v1447_v63 = vmax.f32 %v1431_v10, 0.0  ;;  %v2245_v12 = vpop.f32.mrb[32].mxu1 }
 0x13e   : > { %v1279_v14 = vpop.f32.mrb[20].mxu0  ;;  %v1463_v15 = vpack.c.bf16 %v1449_v8, %v1448_v11  ;;  %v1161_v5 = vadd.f32 %v2245_v12, %v858_v27  ;;  %v1124_v16 = vpop.f32.mrb[33].mxu1 }
 0x13f   : > { %v1286_v18 = vadd.f32 %v1279_v14, %v864_v54  ;;  %v2269_v19 = vpop.f32.mrb[21].mxu0  ;;  %v1462_v20 = vpack.c.bf16 %v1447_v63, %v1446_v13  ;;  %v1159_v21 = vadd.f32 %v1124_v16, %v2775_v17  ;;  %v2246_v23 = vpop.f32.mrb[34].mxu1 }
 0x140   : > { %v1282_v24 = vpop.f32.mrb[22].mxu0  ;;  %2048 = vst [vmem:[%s2810_s9 + $0x8] sm:$0xff] %v1463_v15   ;;  %v1544_v25 = vunpack.c.l.bf16 %v1463_v15  ;;  %v1545_v26 = vunpack.c.h.bf16 %v1463_v15  ;;  %v1436_v28 = vadd.f32 %v2799_v60, %v1161_v5  ;;  %v1127_v29 = vpop.f32.mrb[35].mxu1  ;;  %v1162_v34 = vadd.f32 %v2246_v23, %v2779_v32 }
 0x141   : > { %v2270_v30 = vpop.f32.mrb[23].mxu0  ;;  %2012 = vst [vmem:[%s2810_s9] sm:$0xff] %v1462_v20   ;;  %v1542_v31 = vunpack.c.l.bf16 %v1462_v20  ;;  %v1543_v33 = vunpack.c.h.bf16 %v1462_v20  ;;  %v1442_v27 = vadd.f32 %v2799_v60, %v1286_v18  ;;  %v1434_v35 = vadd.f32 %v2799_v60, %v1159_v21 }
 0x142   : > { %v1581_v36 = vmul.f32 %v1544_v25, %v1544_v25  ;;  %v1582_v41 = vmul.f32 %v1545_v26, %v1545_v26  ;;  %v1437_v42 = vadd.f32 %v2799_v60, %v1162_v34  ;;  %v1160_v44 = vadd.f32 %v1127_v29, %v2777_v22 }
 0x143   : > { %v1558_v17 = vadd.f32 %v1543_v33, %v1542_v31  ;;  %v1579_v38 = vmul.f32 %v1542_v31, %v1542_v31  ;;  %v1580_v40 = vmul.f32 %v1543_v33, %v1543_v33  ;;  %v1287_v46 = vadd.f32 %v1282_v24, %v865_v57 }
 0x144   : > { %v1452_v50 = vmax.f32 %v1436_v28, 0.0  ;;  %v1458_v52 = vmax.f32 %v1442_v27, 0.0  ;;  %v1453_v54 = vmax.f32 %v1437_v42, 0.0  ;;  %v1435_v32 = vadd.f32 %v2799_v60, %v1160_v44 }
 0x145   : > { %v1559_v47 = vadd.f32 %v1558_v17, %v1544_v25  ;;  %v1595_v49 = vadd.f32 %v1580_v40, %v1579_v38  ;;  %v2249_v53 = vpop.f32.mrb[36].mxu1  ;;  %v1443_v55 = vadd.f32 %v2799_v60, %v1287_v46  ;;  %v1450_v61 = vmax.f32 %v1434_v35, 0.0 }
 0x146   : > { %v1165_v56 = vadd.f32 %v2249_v53, %v2789_v48  ;;  %v1140_v58 = vpop.f32.mrb[37].mxu1  ;;  %v1465_v0 = vpack.c.bf16 %v1453_v54, %v1452_v50  ;;  %v1451_v2 = vmax.f32 %v1435_v32, 0.0 }
 0x147   : > { %v1596_v59 = vadd.f32 %v1595_v49, %v1581_v36  ;;  %v1560_v62 = vadd.f32 %v1559_v47, %v1545_v26  ;;  %v1163_v22 = vadd.f32 %v1140_v58, %v2781_v37  ;;  %v2250_v57 = vpop.f32.mrb[38].mxu1  ;;  %v1459_v3 = vmax.f32 %v1443_v55, 0.0 }
 0x148   : > { %v1440_v4 = vadd.f32 %v2799_v60, %v1165_v56  ;;  %v1143_v6 = vpop.f32.mrb[39].mxu1  ;;  %v1166_v48 = vadd.f32 %v2250_v57, %v2791_v51  ;;  %2050 = vst [vmem:[%s2810_s9 + $0x18] sm:$0xff] %v1465_v0   ;;  %v1464_v10 = vpack.c.bf16 %v1451_v2, %v1450_v61  ;;  %v1548_v51 = vunpack.c.l.bf16 %v1465_v0 }
 0x149   : > { %v1597_v7 = vadd.f32 %v1596_v59, %v1582_v41  ;;  %v1438_v9 = vadd.f32 %v2799_v60, %v1163_v22  ;;  %v1164_v1 = vadd.f32 %v1143_v6, %v2785_v43  ;;  %v1468_v11 = vpack.c.bf16 %v1459_v3, %v1458_v52 }
 0x14a   : > { %v1441_v37 = vadd.f32 %v2799_v60, %v1166_v48  ;;  %2049 = vst [vmem:[%s2810_s9 + $0x10] sm:$0xff] %v1464_v10   ;;  %v1546_v13 = vunpack.c.l.bf16 %v1464_v10  ;;  %v1547_v63 = vunpack.c.h.bf16 %v1464_v10  ;;  %v1456_v12 = vmax.f32 %v1440_v4, 0.0 }
 0x14b   : > { %v1439_v8 = vadd.f32 %v2799_v60, %v1164_v1  ;;  %2053 = vst [vmem:[%s2810_s9 + $0x30] sm:$0xff] %v1468_v11   ;;  %v1454_v14 = vmax.f32 %v1438_v9, 0.0  ;;  %v1549_v20 = vunpack.c.h.bf16 %v1465_v0  ;;  %v1585_v26 = vmul.f32 %v1548_v51, %v1548_v51 }
 0x14c   : > { %v1457_v15 = vmax.f32 %v1441_v37, 0.0  ;;  %v1561_v16 = vadd.f32 %v1560_v62, %v1546_v13  ;;  %v1583_v43 = vmul.f32 %v1546_v13, %v1546_v13  ;;  %v1584_v23 = vmul.f32 %v1547_v63, %v1547_v63 }
 0x14d   : > { %v1455_v5 = vmax.f32 %v1439_v8, 0.0  ;;  %v1586_v31 = vmul.f32 %v1549_v20, %v1549_v20  ;;  %v1554_v54 = vunpack.c.l.bf16 %v1468_v11  ;;  %v1555_v59 = vunpack.c.h.bf16 %v1468_v11 }
 0x14e   : > { %v1467_v18 = vpack.c.bf16 %v1457_v15, %v1456_v12  ;;  %v1562_v21 = vadd.f32 %v1561_v16, %v1547_v63  ;;  %v1598_v24 = vadd.f32 %v1597_v7, %v1583_v43  ;;  %v1616_v15 = vlaneseq }
 0x14f   : > { %v1466_v19 = vpack.c.bf16 %v1455_v5, %v1454_v14  ;;  %v1591_v0 = vmul.f32 %v1554_v54, %v1554_v54 }
 0x150   : > { %2052 = vst [vmem:[%s2810_s9 + $0x28] sm:$0xff] %v1467_v18   ;;  %v1563_v28 = vadd.f32 %v1562_v21, %v1548_v51  ;;  %v1599_v29 = vadd.f32 %v1598_v24, %v1584_v23  ;;  %v1552_v36 = vunpack.c.l.bf16 %v1467_v18  ;;  %v1553_v42 = vunpack.c.h.bf16 %v1467_v18 }
 0x151   : > { %2051 = vst [vmem:[%s2810_s9 + $0x20] sm:$0xff] %v1466_v19   ;;  %v1550_v25 = vunpack.c.l.bf16 %v1466_v19  ;;  %v1551_v30 = vunpack.c.h.bf16 %v1466_v19  ;;  %v1617_v18 = vshrl.u32 %v1616_v15, 7 }
 0x152   : > { %v1600_v33 = vadd.f32 %v1599_v29, %v1585_v26  ;;  %v1564_v27 = vadd.f32 %v1563_v28, %v1549_v20  ;;  %v1589_v32 = vmul.f32 %v1552_v36, %v1552_v36 }
 0x153   : > { %v1587_v34 = vmul.f32 %v1550_v25, %v1550_v25  ;;  %v1588_v44 = vmul.f32 %v1551_v30, %v1551_v30  ;;  %vm1619_vm1 = vcmp.eq.s32.totalorder %v1617_v18, 1  ;;  %vm1618_vm2 = vcmp.eq.s32.totalorder %v1617_v18, 0 }
 0x154   : > { %v1565_v17 = vadd.f32 %v1564_v27, %v1550_v25  ;;  %v1601_v38 = vadd.f32 %v1600_v33, %v1586_v31 }
 0x155   : > { %v1396_v35 = vpop.f32.mrb[40].mxu1 }
 0x156   : > { %v1403_v40 = vadd.f32 %v1396_v35, %v2783_v39  ;;  %v2289_v41 = vpop.f32.mrb[41].mxu1  ;;  %v1566_v47 = vadd.f32 %v1565_v17, %v1551_v30  ;;  %v1602_v49 = vadd.f32 %v1601_v38, %v1587_v34  ;;  %v1590_v39 = vmul.f32 %v1553_v42, %v1553_v42 }
 0x157   : > { %v1399_v46 = vpop.f32.mrb[42].mxu1 }
 0x158   : > { %v1444_v50 = vadd.f32 %v2799_v60, %v1403_v40  ;;  %v1404_v52 = vadd.f32 %v1399_v46, %v2787_v45  ;;  %v2290_v53 = vpop.f32.mrb[43].mxu1  ;;  %v1567_v55 = vadd.f32 %v1566_v47, %v1552_v36  ;;  %v1603_v56 = vadd.f32 %v1602_v49, %v1588_v44 }
 0x159   : > { %v1592_v45 = vmul.f32 %v1555_v59, %v1555_v59 }
 0x15a   : > { %v1445_v58 = vadd.f32 %v2799_v60, %v1404_v52  ;;  %v1568_v61 = vadd.f32 %v1567_v55, %v1553_v42  ;;  %v1604_v62 = vadd.f32 %v1603_v56, %v1589_v32  ;;  %v1460_v22 = vmax.f32 %v1444_v50, 0.0 }
 0x15c   : > { %v1461_v57 = vmax.f32 %v1445_v58, 0.0  ;;  %v1605_v2 = vadd.f32 %v1604_v62, %v1590_v39  ;;  %v1569_v4 = vadd.f32 %v1568_v61, %v1554_v54 }
 0x15e   : > { %v1469_v3 = vpack.c.bf16 %v1461_v57, %v1460_v22  ;;  %v1570_v9 = vadd.f32 %v1569_v4, %v1555_v59  ;;  %v1606_v48 = vadd.f32 %v1605_v2, %v1591_v0 }
 0x160   : > { %2054 = vst [vmem:[%s2810_s9 + $0x38] sm:$0xff] %v1469_v3   ;;  %v1556_v6 = vunpack.c.l.bf16 %v1469_v3  ;;  %v1557_v7 = vunpack.c.h.bf16 %v1469_v3  ;;  %v1607_v10 = vadd.f32 %v1606_v48, %v1592_v45 }
 0x162   : > { %v1571_v60 = vadd.f32 %v1570_v9, %v1556_v6  ;;  %v1593_v1 = vmul.f32 %v1556_v6, %v1556_v6  ;;  %v1594_v37 = vmul.f32 %v1557_v7, %v1557_v7 }
 0x164   : > { %v1572_v11 = vadd.f32 %v1571_v60, %v1557_v7  ;;  %v1608_v8 = vadd.f32 %v1607_v10, %v1593_v1 }
 0x166   : > { %v1573_v13 = vrot.slane %v1572_v11, 4  ;;  %v1609_v63 = vadd.f32 %v1608_v8, %v1594_v37 }
 0x168   : > { %v1574_v12 = vadd.f32 %v1573_v13, %v1572_v11  ;;  %v1610_v14 = vrot.slane %v1609_v63, 4 }
 0x16a   : > { %v1575_v5 = vrot.slane %v1574_v12, 2  ;;  %v1611_v51 = vadd.f32 %v1610_v14, %v1609_v63 }
 0x16c   : > { %v1576_v16 = vadd.f32 %v1575_v5, %v1574_v12  ;;  %v1612_v43 = vrot.slane %v1611_v51, 2 }
 0x16e   : > { %v1613_v19 = vadd.f32 %v1612_v43, %v1611_v51  ;;  %v1577_v20 = vrot.slane %v1576_v16, 1 }
 0x170   : > { %v1614_v21 = vrot.slane %v1613_v19, 1  ;;  %v1578_v24 = vadd.f32 %v1577_v20, %v1576_v16 }
 0x172   : > { %v1615_v23 = vadd.f32 %v1614_v21, %v1613_v19 }
 0x174   : > { %v1620_v25 = vsel %vm1619_vm1, %v1615_v23, 0.0 }
 0x175   : > { %v1621_v26 = vsel %vm1618_vm2, %v1578_v24, %v1620_v25 }
 0x176   : > { %1622 = vst [vmem:[%s437_s28] sm:$0xff] %v1621_v26 }
 0x177 PF: > { %s17_s25 = sadd.s32 1, %s2430_s25   ;;  %s2869_s21 = smov %s2422_s23 }
 0x178   : > { %p14_p11 = scmp.ge.s32.totalorder %s17_s25, 6   ;;  %s2870_s22 = smov %s2426_s24 }
 0x179   : > { %s2871_s23 = smov %s2874_s26  ;;  %s2872_s24 = smov %s2878_s27 }
 0x17a   :  { %16 = sbr.rel (!%p14_p11) target bundleno = 3 (0x3), region = 90 }

</bundles_post_ra>
